<compile_context>
chip_gen: v7x
topology: tpu7x:2x2x1
jax: 0.10.0
libtpu: 0.0.40
codegen_flags: <defaults>
</compile_context>

<pallas_src>
import functools
import math

import jax
import jax.numpy as jnp
from jax.experimental import pallas as pl
from jax.experimental.pallas import tpu as pltpu


def _cropped_transconv_kernel(x_ref, w_ref, b_ref, o_ref, xs_ref, *,
                              k, Cin, Wp, HWp, NB):
    """One grid step processes NB batch elements.

    x_ref:  (NB, Cin, L)      zero-padded activations, spatial dims flattened
    w_ref:  (Cout, k*k*Cin)   single-GEMM weight matrix (flipped ConvTranspose2d taps)
    b_ref:  (Cout, 1)         bias column (lane-broadcast)
    o_ref:  (NB, Cout, HWp)   "wide" output; columns x' >= W are garbage, cropped by caller
    xs_ref: (k*k*Cin, HWp)    VMEM scratch: stacked shifted slices (fused im2col tile)
    """
    for i in range(NB):                                   # static; NB is 1 or the full batch
        x_i = x_ref[i, :, :]                              # (Cin, L), loaded once
        # Fused im2col: tap (a, b) == static lane offset a*Wp + b on the width-padded rows.
        for a in range(k):
            for b in range(k):
                t = a * k + b
                s = a * Wp + b
                xs_ref[t * Cin:(t + 1) * Cin, :] = x_i[:, s:s + HWp]
        # One K = k*k*Cin GEMM instead of k*k small K=Cin dots.
        acc = jnp.dot(w_ref[...], xs_ref[...], preferred_element_type=jnp.float32)
        o_ref[i] = (acc + b_ref[...]).astype(o_ref.dtype)


def _tensorcores_per_chip() -> int:
    """2 TensorCores per chip on v4/v5p (megacore) and v7x; 1 on v2/v3/v5e/v6e."""
    try:
        kind = jax.devices()[0].device_kind.lower().replace(" ", "")
    except Exception:
        return 1
    return 2 if any(tag in kind for tag in ("v7", "7x", "v4", "v5p")) else 1


@functools.partial(jax.jit, static_argnames=("size", "kernel_size"))
def cropped_trans_conv(x_nchw, weight, bias, *, size, kernel_size):
    """weight: (Cin, Cout, k, k) as in torch.nn.ConvTranspose2d; x_nchw: (N, Cin, size, size)."""
    N, Cin, H, W = x_nchw.shape
    assert H == size and W == size
    Cout = weight.shape[1]
    k = kernel_size
    cs = (k - 1) // 2                                     # crop_start

    # Cropped transposed conv == correlation with the flipped kernel on this zero padding.
    pad_lo = (k - 1) - cs                                 # top/left pad (pad_hi = cs)

    # Padded ("wide") row width; round up so H*Wp is a multiple of 128 (lane-dense output
    # stores) unless that would more than double the columns (fallback = masked stores,
    # correct but a known slow path).
    Wp_min = W + k - 1
    lane_step = 128 // math.gcd(H, 128)
    Wp = -(-Wp_min // lane_step) * lane_step
    if Wp > 2 * Wp_min:
        Wp = Wp_min
    Hp = H + k                                            # +1 extra zero row for the largest flat shift
    HWp = H * Wp
    L = Hp * Wp
    K = k * k * Cin

    xp = jnp.pad(
        x_nchw,
        ((0, 0), (0, 0),
         (pad_lo, Hp - H - pad_lo),                       # bottom = pad_hi + 1 extra zero row
         (pad_lo, Wp - W - pad_lo)))                      # right >= pad_hi (+ lane rounding)
    x_flat = xp.reshape(N, Cin, L)

    # w_flat[oc, (a*k+b)*Cin + ic] = weight[ic, oc, k-1-a, k-1-b]  (single-GEMM weight)
    w_flat = (jnp.flip(weight, axis=(2, 3))
              .transpose(1, 2, 3, 0)                      # (Cout, k, k, Cin)
              .reshape(Cout, K))
    b_col = bias.reshape(Cout, 1)

    # Grid: one batch element per step on 2-TC chips (each core takes a batch element);
    # fold the batch into a single step on single-TC v5e/v6e where per-step overhead
    # dominates at this problem size.
    n_tc = _tensorcores_per_chip()
    if n_tc > 1 and N > 1:
        steps, NB = N, 1
    elif N <= 4:
        steps, NB = 1, N
    else:
        steps, NB = N, 1

    kernel = functools.partial(_cropped_transconv_kernel,
                               k=k, Cin=Cin, Wp=Wp, HWp=HWp, NB=NB)
    out_wide = pl.pallas_call(
        kernel,
        out_shape=jax.ShapeDtypeStruct((N, Cout, HWp), x_nchw.dtype),
        grid_spec=pltpu.PrefetchScalarGridSpec(
            num_scalar_prefetch=0,
            grid=(steps,),
            in_specs=[
                pl.BlockSpec((NB, Cin, L), lambda n: (n, 0, 0)),      # activations
                pl.BlockSpec((Cout, K), lambda n: (0, 0)),            # weights (resident)
                pl.BlockSpec((Cout, 1), lambda n: (0, 0)),            # bias (resident)
            ],
            out_specs=pl.BlockSpec((NB, Cout, HWp), lambda n: (n, 0, 0)),
            scratch_shapes=[pltpu.VMEM((K, HWp), jnp.float32)],       # stacked im2col tile
        ),
        compiler_params=pltpu.CompilerParams(
            dimension_semantics=(("parallel",) if steps > 1 else ("arbitrary",))),
        cost_estimate=pl.CostEstimate(
            flops=2 * N * K * Cout * HWp,
            transcendentals=0,
            bytes_accessed=4 * (N * Cin * L + Cout * K + Cout + N * Cout * HWp)),
    )(x_flat, w_flat, b_col)

    # (N, Cout, H*Wp) -> crop flat-shift garbage columns -> (N, Cout, H, W); already NCHW.
    return out_wide.reshape(N, Cout, H, Wp)[..., :W]


def _reference(x_nchw, weight, bias, *, size, kernel_size):
    """Pure-JAX reference via lax.conv (independent code path) for a sanity check."""
    k = kernel_size
    cs = (k - 1) // 2
    k_oihw = jnp.flip(weight, axis=(2, 3)).transpose(1, 0, 2, 3)   # (Cout, Cin, k, k)
    y = jax.lax.conv_general_dilated(
        x_nchw, k_oihw, window_strides=(1, 1),
        padding=[(k - 1 - cs, cs), (k - 1 - cs, cs)],
        dimension_numbers=("NCHW", "OIHW", "NCHW"))
    return y + bias.reshape(1, -1, 1, 1)


if __name__ == "__main__":
    size, in_channels, out_channels, kernel_size = 16, 4, 8, 3
    batch = 2

    key = jax.random.PRNGKey(0)
    kx, kw, kb = jax.random.split(key, 3)
    x = jax.random.normal(kx, (batch, in_channels, size, size), jnp.float32)

    # deterministic, PyTorch-like uniform init (shapes from nn.ConvTranspose2d)
    fan = in_channels * kernel_size * kernel_size
    bound = 1.0 / (fan ** 0.5)
    weight = jax.random.uniform(
        kw, (in_channels, out_channels, kernel_size, kernel_size),
        jnp.float32, -bound, bound)
    bias = jax.random.uniform(kb, (out_channels,), jnp.float32, -bound, bound)

    out = cropped_trans_conv(x, weight, bias, size=size, kernel_size=kernel_size)
    out = jax.block_until_ready(out)

    ref = _reference(x, weight, bias, size=size, kernel_size=kernel_size)
    assert out.shape == (batch, out_channels, size, size)
    assert jnp.allclose(out, ref, atol=1e-4, rtol=1e-4)
    print("KERNEL_OK")
</pallas_src>

<mosaic_0001>
module attributes {stable_mosaic.version = 11 : i64} {
  func.func @_cropped_transconv_kernel(%arg0: i32, %arg1: memref<2x4x456xf32, #tpu.memory_space<vmem>>, %arg2: memref<8x36xf32, #tpu.memory_space<vmem>>, %arg3: memref<8x1xf32, #tpu.memory_space<vmem>>, %arg4: memref<2x8x384xf32, #tpu.memory_space<vmem>>, %arg5: memref<36x384xf32, #tpu.memory_space<vmem>>) attributes {dimension_semantics = [#tpu.dimension_semantics<arbitrary>], iteration_bounds = array<i64: 1>, scalar_prefetch = 0 : i64, scratch_operands = 1 : i64, tpu.core_type = #tpu.core_type<tc>, window_params = [{transform_indices = @transform_0, window_bounds = array<i64: 2, 4, 456>}, {pipeline_mode = #tpu.pipeline_mode<synchronous>, transform_indices = @transform_1, window_bounds = array<i64: 8, 36>}, {pipeline_mode = #tpu.pipeline_mode<synchronous>, transform_indices = @transform_2, window_bounds = array<i64: 8, 1>}, {transform_indices = @transform_3, window_bounds = array<i64: 2, 8, 384>}]} {
    %c0 = arith.constant 0 : index
    %c0_0 = arith.constant 0 : index
    %c0_1 = arith.constant 0 : index
    %0 = vector.load %arg1[%c0, %c0_0, %c0_1] : memref<2x4x456xf32, #tpu.memory_space<vmem>>, vector<1x4x456xf32>
    %1 = vector.shape_cast %0 : vector<1x4x456xf32> to vector<4x456xf32>
    %2 = vector.extract_strided_slice %1 {offsets = [0, 0], sizes = [4, 384], strides = [1, 1]} : vector<4x456xf32> to vector<4x384xf32>
    %c0_2 = arith.constant 0 : index
    %c0_3 = arith.constant 0 : index
    %3 = vector.load %arg5[%c0_2, %c0_3] : memref<36x384xf32, #tpu.memory_space<vmem>>, vector<4x384xf32>
    tpu.vector_store %arg5[%c0_2, %c0_3], %2 {strides = array<i32>} : memref<36x384xf32, #tpu.memory_space<vmem>>, vector<4x384xf32>,
    %4 = vector.extract_strided_slice %1 {offsets = [0, 1], sizes = [4, 384], strides = [1, 1]} : vector<4x456xf32> to vector<4x384xf32>
    %c4 = arith.constant 4 : index
    %c0_4 = arith.constant 0 : index
    %5 = vector.load %arg5[%c4, %c0_4] : memref<36x384xf32, #tpu.memory_space<vmem>>, vector<4x384xf32>
    tpu.vector_store %arg5[%c4, %c0_4], %4 {strides = array<i32>} : memref<36x384xf32, #tpu.memory_space<vmem>>, vector<4x384xf32>,
    %6 = vector.extract_strided_slice %1 {offsets = [0, 2], sizes = [4, 384], strides = [1, 1]} : vector<4x456xf32> to vector<4x384xf32>
    %c8 = arith.constant 8 : index
    %c0_5 = arith.constant 0 : index
    %7 = vector.load %arg5[%c8, %c0_5] : memref<36x384xf32, #tpu.memory_space<vmem>>, vector<4x384xf32>
    tpu.vector_store %arg5[%c8, %c0_5], %6 {strides = array<i32>} : memref<36x384xf32, #tpu.memory_space<vmem>>, vector<4x384xf32>,
    %8 = vector.extract_strided_slice %1 {offsets = [0, 24], sizes = [4, 384], strides = [1, 1]} : vector<4x456xf32> to vector<4x384xf32>
    %c12 = arith.constant 12 : index
    %c0_6 = arith.constant 0 : index
    %9 = vector.load %arg5[%c12, %c0_6] : memref<36x384xf32, #tpu.memory_space<vmem>>, vector<4x384xf32>
    tpu.vector_store %arg5[%c12, %c0_6], %8 {strides = array<i32>} : memref<36x384xf32, #tpu.memory_space<vmem>>, vector<4x384xf32>,
    %10 = vector.extract_strided_slice %1 {offsets = [0, 25], sizes = [4, 384], strides = [1, 1]} : vector<4x456xf32> to vector<4x384xf32>
    %c16 = arith.constant 16 : index
    %c0_7 = arith.constant 0 : index
    %11 = vector.load %arg5[%c16, %c0_7] : memref<36x384xf32, #tpu.memory_space<vmem>>, vector<4x384xf32>
    tpu.vector_store %arg5[%c16, %c0_7], %10 {strides = array<i32>} : memref<36x384xf32, #tpu.memory_space<vmem>>, vector<4x384xf32>,
    %12 = vector.extract_strided_slice %1 {offsets = [0, 26], sizes = [4, 384], strides = [1, 1]} : vector<4x456xf32> to vector<4x384xf32>
    %c20 = arith.constant 20 : index
    %c0_8 = arith.constant 0 : index
    %13 = vector.load %arg5[%c20, %c0_8] : memref<36x384xf32, #tpu.memory_space<vmem>>, vector<4x384xf32>
    tpu.vector_store %arg5[%c20, %c0_8], %12 {strides = array<i32>} : memref<36x384xf32, #tpu.memory_space<vmem>>, vector<4x384xf32>,
    %14 = vector.extract_strided_slice %1 {offsets = [0, 48], sizes = [4, 384], strides = [1, 1]} : vector<4x456xf32> to vector<4x384xf32>
    %c24 = arith.constant 24 : index
    %c0_9 = arith.constant 0 : index
    %15 = vector.load %arg5[%c24, %c0_9] : memref<36x384xf32, #tpu.memory_space<vmem>>, vector<4x384xf32>
    tpu.vector_store %arg5[%c24, %c0_9], %14 {strides = array<i32>} : memref<36x384xf32, #tpu.memory_space<vmem>>, vector<4x384xf32>,
    %16 = vector.extract_strided_slice %1 {offsets = [0, 49], sizes = [4, 384], strides = [1, 1]} : vector<4x456xf32> to vector<4x384xf32>
    %c28 = arith.constant 28 : index
    %c0_10 = arith.constant 0 : index
    %17 = vector.load %arg5[%c28, %c0_10] : memref<36x384xf32, #tpu.memory_space<vmem>>, vector<4x384xf32>
    tpu.vector_store %arg5[%c28, %c0_10], %16 {strides = array<i32>} : memref<36x384xf32, #tpu.memory_space<vmem>>, vector<4x384xf32>,
    %18 = vector.extract_strided_slice %1 {offsets = [0, 50], sizes = [4, 384], strides = [1, 1]} : vector<4x456xf32> to vector<4x384xf32>
    %c32 = arith.constant 32 : index
    %c0_11 = arith.constant 0 : index
    %19 = vector.load %arg5[%c32, %c0_11] : memref<36x384xf32, #tpu.memory_space<vmem>>, vector<4x384xf32>
    tpu.vector_store %arg5[%c32, %c0_11], %18 {strides = array<i32>} : memref<36x384xf32, #tpu.memory_space<vmem>>, vector<4x384xf32>,
    %c0_12 = arith.constant 0 : index
    %c0_13 = arith.constant 0 : index
    %20 = vector.load %arg2[%c0_12, %c0_13] : memref<8x36xf32, #tpu.memory_space<vmem>>, vector<8x36xf32>
    %c0_14 = arith.constant 0 : index
    %c0_15 = arith.constant 0 : index
    %21 = vector.load %arg5[%c0_14, %c0_15] : memref<36x384xf32, #tpu.memory_space<vmem>>, vector<36x384xf32>
    %cst = arith.constant dense<0.000000e+00> : vector<8x384xf32>
    %22 = tpu.matmul %20, %21, %cst {dimension_numbers = #tpu.dot_dimension_numbers<[1], [0], [0], [1], [0, 0, 1, 1], [], []>} : vector<8x36xf32>, vector<36x384xf32>, vector<8x384xf32> -> vector<8x384xf32>
    %c0_16 = arith.constant 0 : index
    %c0_17 = arith.constant 0 : index
    %23 = vector.load %arg3[%c0_16, %c0_17] : memref<8x1xf32, #tpu.memory_space<vmem>>, vector<8x1xf32>
    %24 = vector.broadcast %23 : vector<8x1xf32> to vector<8x384xf32>
    %25 = arith.addf %22, %24 : vector<8x384xf32>
    %c0_18 = arith.constant 0 : index
    %c0_19 = arith.constant 0 : index
    %c0_20 = arith.constant 0 : index
    %26 = vector.load %arg4[%c0_18, %c0_19, %c0_20] : memref<2x8x384xf32, #tpu.memory_space<vmem>>, vector<1x8x384xf32>
    %27 = vector.shape_cast %26 : vector<1x8x384xf32> to vector<8x384xf32>
    %28 = vector.shape_cast %25 : vector<8x384xf32> to vector<1x8x384xf32>
    tpu.vector_store %arg4[%c0_18, %c0_19, %c0_20], %28 {strides = array<i32>} : memref<2x8x384xf32, #tpu.memory_space<vmem>>, vector<1x8x384xf32>,
    %c1 = arith.constant 1 : index
    %c0_21 = arith.constant 0 : index
    %c0_22 = arith.constant 0 : index
    %29 = vector.load %arg1[%c1, %c0_21, %c0_22] : memref<2x4x456xf32, #tpu.memory_space<vmem>>, vector<1x4x456xf32>
    %30 = vector.shape_cast %29 : vector<1x4x456xf32> to vector<4x456xf32>
    %31 = vector.extract_strided_slice %30 {offsets = [0, 0], sizes = [4, 384], strides = [1, 1]} : vector<4x456xf32> to vector<4x384xf32>
    %c0_23 = arith.constant 0 : index
    %c0_24 = arith.constant 0 : index
    %32 = vector.load %arg5[%c0_23, %c0_24] : memref<36x384xf32, #tpu.memory_space<vmem>>, vector<4x384xf32>
    tpu.vector_store %arg5[%c0_23, %c0_24], %31 {strides = array<i32>} : memref<36x384xf32, #tpu.memory_space<vmem>>, vector<4x384xf32>,
    %33 = vector.extract_strided_slice %30 {offsets = [0, 1], sizes = [4, 384], strides = [1, 1]} : vector<4x456xf32> to vector<4x384xf32>
    %c4_25 = arith.constant 4 : index
    %c0_26 = arith.constant 0 : index
    %34 = vector.load %arg5[%c4_25, %c0_26] : memref<36x384xf32, #tpu.memory_space<vmem>>, vector<4x384xf32>
    tpu.vector_store %arg5[%c4_25, %c0_26], %33 {strides = array<i32>} : memref<36x384xf32, #tpu.memory_space<vmem>>, vector<4x384xf32>,
    %35 = vector.extract_strided_slice %30 {offsets = [0, 2], sizes = [4, 384], strides = [1, 1]} : vector<4x456xf32> to vector<4x384xf32>
    %c8_27 = arith.constant 8 : index
    %c0_28 = arith.constant 0 : index
    %36 = vector.load %arg5[%c8_27, %c0_28] : memref<36x384xf32, #tpu.memory_space<vmem>>, vector<4x384xf32>
    tpu.vector_store %arg5[%c8_27, %c0_28], %35 {strides = array<i32>} : memref<36x384xf32, #tpu.memory_space<vmem>>, vector<4x384xf32>,
    %37 = vector.extract_strided_slice %30 {offsets = [0, 24], sizes = [4, 384], strides = [1, 1]} : vector<4x456xf32> to vector<4x384xf32>
    %c12_29 = arith.constant 12 : index
    %c0_30 = arith.constant 0 : index
    %38 = vector.load %arg5[%c12_29, %c0_30] : memref<36x384xf32, #tpu.memory_space<vmem>>, vector<4x384xf32>
    tpu.vector_store %arg5[%c12_29, %c0_30], %37 {strides = array<i32>} : memref<36x384xf32, #tpu.memory_space<vmem>>, vector<4x384xf32>,
    %39 = vector.extract_strided_slice %30 {offsets = [0, 25], sizes = [4, 384], strides = [1, 1]} : vector<4x456xf32> to vector<4x384xf32>
    %c16_31 = arith.constant 16 : index
    %c0_32 = arith.constant 0 : index
    %40 = vector.load %arg5[%c16_31, %c0_32] : memref<36x384xf32, #tpu.memory_space<vmem>>, vector<4x384xf32>
    tpu.vector_store %arg5[%c16_31, %c0_32], %39 {strides = array<i32>} : memref<36x384xf32, #tpu.memory_space<vmem>>, vector<4x384xf32>,
    %41 = vector.extract_strided_slice %30 {offsets = [0, 26], sizes = [4, 384], strides = [1, 1]} : vector<4x456xf32> to vector<4x384xf32>
    %c20_33 = arith.constant 20 : index
    %c0_34 = arith.constant 0 : index
    %42 = vector.load %arg5[%c20_33, %c0_34] : memref<36x384xf32, #tpu.memory_space<vmem>>, vector<4x384xf32>
    tpu.vector_store %arg5[%c20_33, %c0_34], %41 {strides = array<i32>} : memref<36x384xf32, #tpu.memory_space<vmem>>, vector<4x384xf32>,
    %43 = vector.extract_strided_slice %30 {offsets = [0, 48], sizes = [4, 384], strides = [1, 1]} : vector<4x456xf32> to vector<4x384xf32>
    %c24_35 = arith.constant 24 : index
    %c0_36 = arith.constant 0 : index
    %44 = vector.load %arg5[%c24_35, %c0_36] : memref<36x384xf32, #tpu.memory_space<vmem>>, vector<4x384xf32>
    tpu.vector_store %arg5[%c24_35, %c0_36], %43 {strides = array<i32>} : memref<36x384xf32, #tpu.memory_space<vmem>>, vector<4x384xf32>,
    %45 = vector.extract_strided_slice %30 {offsets = [0, 49], sizes = [4, 384], strides = [1, 1]} : vector<4x456xf32> to vector<4x384xf32>
    %c28_37 = arith.constant 28 : index
    %c0_38 = arith.constant 0 : index
    %46 = vector.load %arg5[%c28_37, %c0_38] : memref<36x384xf32, #tpu.memory_space<vmem>>, vector<4x384xf32>
    tpu.vector_store %arg5[%c28_37, %c0_38], %45 {strides = array<i32>} : memref<36x384xf32, #tpu.memory_space<vmem>>, vector<4x384xf32>,
    %47 = vector.extract_strided_slice %30 {offsets = [0, 50], sizes = [4, 384], strides = [1, 1]} : vector<4x456xf32> to vector<4x384xf32>
    %c32_39 = arith.constant 32 : index
    %c0_40 = arith.constant 0 : index
    %48 = vector.load %arg5[%c32_39, %c0_40] : memref<36x384xf32, #tpu.memory_space<vmem>>, vector<4x384xf32>
    tpu.vector_store %arg5[%c32_39, %c0_40], %47 {strides = array<i32>} : memref<36x384xf32, #tpu.memory_space<vmem>>, vector<4x384xf32>,
    %c0_41 = arith.constant 0 : index
    %c0_42 = arith.constant 0 : index
    %49 = vector.load %arg2[%c0_41, %c0_42] : memref<8x36xf32, #tpu.memory_space<vmem>>, vector<8x36xf32>
    %c0_43 = arith.constant 0 : index
    %c0_44 = arith.constant 0 : index
    %50 = vector.load %arg5[%c0_43, %c0_44] : memref<36x384xf32, #tpu.memory_space<vmem>>, vector<36x384xf32>
    %cst_45 = arith.constant dense<0.000000e+00> : vector<8x384xf32>
    %51 = tpu.matmul %49, %50, %cst_45 {dimension_numbers = #tpu.dot_dimension_numbers<[1], [0], [0], [1], [0, 0, 1, 1], [], []>} : vector<8x36xf32>, vector<36x384xf32>, vector<8x384xf32> -> vector<8x384xf32>
    %c0_46 = arith.constant 0 : index
    %c0_47 = arith.constant 0 : index
    %52 = vector.load %arg3[%c0_46, %c0_47] : memref<8x1xf32, #tpu.memory_space<vmem>>, vector<8x1xf32>
    %53 = vector.broadcast %52 : vector<8x1xf32> to vector<8x384xf32>
    %54 = arith.addf %51, %53 : vector<8x384xf32>
    %c1_48 = arith.constant 1 : index
    %c0_49 = arith.constant 0 : index
    %c0_50 = arith.constant 0 : index
    %55 = vector.load %arg4[%c1_48, %c0_49, %c0_50] : memref<2x8x384xf32, #tpu.memory_space<vmem>>, vector<1x8x384xf32>
    %56 = vector.shape_cast %55 : vector<1x8x384xf32> to vector<8x384xf32>
    %57 = vector.shape_cast %54 : vector<8x384xf32> to vector<1x8x384xf32>
    tpu.vector_store %arg4[%c1_48, %c0_49, %c0_50], %57 {strides = array<i32>} : memref<2x8x384xf32, #tpu.memory_space<vmem>>, vector<1x8x384xf32>,
    return
  }
  func.func @transform_0(%arg0: i32) -> (i32, i32, i32) {
    %c0_i32 = arith.constant 0 : i32
    %c0_i32_0 = arith.constant 0 : i32
    %c0_i32_1 = arith.constant 0 : i32
    return %arg0, %c0_i32, %c0_i32_0 : i32, i32, i32
  }
  func.func @transform_1(%arg0: i32) -> (i32, i32) {
    %c0_i32 = arith.constant 0 : i32
    %c0_i32_0 = arith.constant 0 : i32
    %c0_i32_1 = arith.constant 0 : i32
    return %c0_i32, %c0_i32_0 : i32, i32
  }
  func.func @transform_2(%arg0: i32) -> (i32, i32) {
    %c0_i32 = arith.constant 0 : i32
    %c0_i32_0 = arith.constant 0 : i32
    %c0_i32_1 = arith.constant 0 : i32
    return %c0_i32, %c0_i32_0 : i32, i32
  }
  func.func @transform_3(%arg0: i32) -> (i32, i32, i32) {
    %c0_i32 = arith.constant 0 : i32
    %c0_i32_0 = arith.constant 0 : i32
    %c0_i32_1 = arith.constant 0 : i32
    return %arg0, %c0_i32, %c0_i32_0 : i32, i32, i32
  }
}

</mosaic_0001>

<bundles_post_ra>
// kernel: cropped_trans_conv.1
= control target key start
LH: loop header
LB: loop body
LE: loop exit
PB: predicated region body
PF: predicated region fallthrough
CT: control target
= control target key end

     0   :  { %s785_s16 = smov 126   ;;  %s786_s17 = smov 127   ;;  %v788_v6 = vmov 0.0|0.0   ;;  %v794_v12 = vmov 0.0   ;;  %vm795_vm0 = vmmov 0   ;;  %vm33_vm1 = vcmask 1039360   ;;  %s1030_s0 = inlined_call_operand.vmem [shape: f32[2,4,456], index: 0, kind: input, shape index: {}]   ;;  %s1031_s2 = inlined_call_operand.vmem [shape: f32[8,1], index: 2, kind: input, shape index: {}]   ;;  %s1032_s1 = inlined_call_operand.vmem [shape: f32[8,36], index: 1, kind: input, shape index: {}]   ;;  %s1033_s3 = inlined_call_operand.vmem [shape: f32[2,8,384], index: 3, kind: output, shape index: {}]  }
   0x1   :  { %v15_v0 = vld [vmem:[%s1030_s0 + $0x8] sm:$0xff]  ;;  %v14_v1 = vld [vmem:[%s1030_s0] sm:$0xff]  ;;  %s787_s18 = smov 104   ;;  %743 = vmatprep.subr.bf16.mxu1 %v788_v6  ;;  %s789_s19 = smov 103   ;;  %v855_v7 = vld [vmem:[%s1030_s0 + $0x18] sm:$0xff]  ;;  %270 = vmatprep.mubr.f32.mxu0 %v794_v12  ;;  %vm52_vm2 = vcmask 1031168  }
   0x2   :  { %48 = vrot.lane.b32.xlu1 %v15_v0, %s785_s16  ;;  %22 = vst [vmem:[#allocation2 + $0x10] sm:$0xf] %v15_v0  ;;  %27 = vrot.lane.b32.xlu0 %v14_v1, %s786_s17  ;;  %20 = vst [vmem:[#allocation2] sm:$0xf] %v14_v1  ;;  %v24_v2 = vcombine.low %v15_v0, %v15_v0  ;;  %v18_v3 = vcombine.high %v14_v1, %v14_v1  ;;  %s790_s20 = smov 102   ;;  %s791_s21 = smov 80  }
   0x3   :  { %v23_v4 = vcombine.low %v14_v1, %v14_v1  ;;  %v43_v5 = vcombine.high %v15_v0, %v15_v0  ;;  %s792_s22 = smov 79   ;;  %s793_s25 = smov 78   ;;  %v361_v8 = vcombine.low %v855_v7, %v855_v7  ;;  %v864_v9 = vld [vmem:[%s1030_s0 + $0x10] sm:$0xff]  ;;  %v379_v13 = vcombine.high %v855_v7, %v855_v7  ;;  %719 = vmatprep.mubr.msk.f32.mxu1 %vm795_vm0, %v794_v12  ;;  %v186_v24 = vld [vmem:[%s1031_s2] sm:$0xff] }
   0x4   :  { %21 = vst [vmem:[#allocation2 + $0x8] sm:$0xf] %v18_v3  ;;  %v871_v10 = vcombine.high %v864_v9, %v864_v9  ;;  %v360_v11 = vcombine.low %v864_v9, %v864_v9  ;;  %vm70_vm3 = vcmask 850944   ;;  %v796_v22 = vmov 0  }
   0x5   :  { %775 = vset.pattern.permute.xlu0 %v796_v22  ;;  %776 = vset.pattern.permute.xlu1 %v796_v22  ;;  %vm88_vm4 = vcmask 842752   ;;  %vm106_vm5 = vcmask 834560   ;;  %vm124_vm6 = vcmask 654336   ;;  %vm142_vm7 = vcmask 646144  }
   0x6   :  { %29 = vrot.lane.b32.xlu0 %v24_v2, %s786_s17  ;;  %46 = vrot.lane.b32.xlu1 %v18_v3, %s785_s16  ;;  %vm160_vm8 = vcmask 637952   ;;  %vm196_vm9 = vcmask 1043456   ;;  %vm192_vm10 = vcmask 293888  }
   0xa   :  { %64 = vrot.lane.b32.xlu0 %v14_v1, %s787_s18  ;;  %66 = vrot.lane.b32.xlu1 %v24_v2, %s787_s18 }
   0xe   :  { %25 = vrot.lane.b32.xlu0 %v23_v4, %s786_s17  ;;  %44 = vrot.lane.b32.xlu1 %v14_v1, %s785_s16 }
  0x12   :  { %62 = vrot.lane.b32.xlu0 %v23_v4, %s787_s18  ;;  %31 = vrot.lane.b32.xlu1 %v15_v0, %s786_s17 }
  0x16   :  { %50 = vrot.lane.b32.xlu0 %v43_v5, %s785_s16  ;;  %68 = vrot.lane.b32.xlu1 %v15_v0, %s787_s18 }
  0x1a   :  { %82 = vrot.lane.b32.xlu0 %v18_v3, %s789_s19  ;;  %84 = vrot.lane.b32.xlu1 %v15_v0, %s789_s19 }
  0x1e   :  { %100 = vrot.lane.b32.xlu0 %v14_v1, %s790_s20  ;;  %102 = vrot.lane.b32.xlu1 %v24_v2, %s790_s20 }
  0x22   :  { %118 = vrot.lane.b32.xlu0 %v18_v3, %s791_s21  ;;  %120 = vrot.lane.b32.xlu1 %v15_v0, %s791_s21 }
  0x26   :  { %136 = vrot.lane.b32.xlu0 %v14_v1, %s792_s22  ;;  %138 = vrot.lane.b32.xlu1 %v24_v2, %s792_s22 }
  0x2a   :  { %80 = vrot.lane.b32.xlu0 %v14_v1, %s789_s19  ;;  %98 = vrot.lane.b32.xlu1 %v23_v4, %s790_s20 }
  0x2e   :  { %116 = vrot.lane.b32.xlu0 %v14_v1, %s791_s21  ;;  %134 = vrot.lane.b32.xlu1 %v23_v4, %s792_s22 }
  0x32   :  { %86 = vrot.lane.b32.xlu0 %v43_v5, %s789_s19  ;;  %104 = vrot.lane.b32.xlu1 %v15_v0, %s790_s20 }
  0x36   :  { %122 = vrot.lane.b32.xlu0 %v43_v5, %s791_s21  ;;  %140 = vrot.lane.b32.xlu1 %v15_v0, %s792_s22 }
  0x3a   :  { %154 = vrot.lane.b32.xlu0 %v18_v3, %s793_s25  ;;  %156 = vrot.lane.b32.xlu1 %v15_v0, %s793_s25 }
  0x3e   :  { %364 = vrot.lane.b32.xlu0 %v864_v9, %s786_s17  ;;  %366 = vrot.lane.b32.xlu1 %v361_v8, %s786_s17 }
  0x42   :  { %382 = vrot.lane.b32.xlu0 %v871_v10, %s785_s16  ;;  %384 = vrot.lane.b32.xlu1 %v855_v7, %s785_s16 }
  0x46   :  { %399 = vrot.lane.b32.xlu0 %v864_v9, %s787_s18  ;;  %401 = vrot.lane.b32.xlu1 %v361_v8, %s787_s18 }
  0x4a   :  { %152 = vrot.lane.b32.xlu0 %v14_v1, %s793_s25  ;;  %362 = vrot.lane.b32.xlu1 %v360_v11, %s786_s17 }
  0x4e   :  { %380 = vrot.lane.b32.xlu0 %v864_v9, %s785_s16  ;;  %397 = vrot.lane.b32.xlu1 %v360_v11, %s787_s18 }
  0x52   :  { %158 = vrot.lane.b32.xlu0 %v43_v5, %s793_s25  ;;  %368 = vrot.lane.b32.xlu1 %v855_v7, %s786_s17 }
  0x56   :  { %386 = vrot.lane.b32.xlu0 %v379_v13, %s785_s16  ;;  %403 = vrot.lane.b32.xlu1 %v855_v7, %s787_s18 }
  0x5a   :  { %416 = vrot.lane.b32.xlu0 %v871_v10, %s789_s19  ;;  %418 = vrot.lane.b32.xlu1 %v855_v7, %s789_s19 }
  0x5e   :  { %433 = vrot.lane.b32.xlu0 %v864_v9, %s790_s20  ;;  %435 = vrot.lane.b32.xlu1 %v361_v8, %s790_s20 }
  0x62   :  { %450 = vrot.lane.b32.xlu0 %v871_v10, %s791_s21  ;;  %452 = vrot.lane.b32.xlu1 %v855_v7, %s791_s21 }
  0x66   :  { %467 = vrot.lane.b32.xlu0 %v864_v9, %s792_s22  ;;  %469 = vrot.lane.b32.xlu1 %v361_v8, %s792_s22 }
  0x6a   :  { %414 = vrot.lane.b32.xlu0 %v864_v9, %s789_s19  ;;  %431 = vrot.lane.b32.xlu1 %v360_v11, %s790_s20 }
  0x6e   :  { %448 = vrot.lane.b32.xlu0 %v864_v9, %s791_s21  ;;  %465 = vrot.lane.b32.xlu1 %v360_v11, %s792_s22 }
  0x72   :  { %420 = vrot.lane.b32.xlu0 %v379_v13, %s789_s19  ;;  %437 = vrot.lane.b32.xlu1 %v855_v7, %s790_s20 }
  0x74   :  { %v49_v14 = vpop.permute.xlu1 %48  ;;  %v28_v15 = vpop.permute.xlu0 %27 }
  0x76   :  { %454 = vrot.lane.b32.xlu0 %v379_v13, %s791_s21  ;;  %471 = vrot.lane.b32.xlu1 %v855_v7, %s792_s22 }
  0x78   :  { %v30_v16 = vpop.permute.xlu0 %29  ;;  %v47_v17 = vpop.permute.xlu1 %46 }
  0x79   :  { %v35_v18 = vsel %vm33_vm1, %v28_v15, %v30_v16  ;;  %v54_v19 = vsel %vm52_vm2, %v47_v17, %v49_v14 }
  0x7a   :  { %41 = vst [vmem:[#allocation2 + $0x8] sm:$0xf0] %v35_v18  ;;  %60 = vst [vmem:[#allocation2 + $0x20] sm:$0xf] %v54_v19  ;;  %484 = vrot.lane.b32.xlu0 %v871_v10, %s793_s25  ;;  %486 = vrot.lane.b32.xlu1 %v855_v7, %s793_s25 }
  0x7c   :  { %v65_v20 = vpop.permute.xlu0 %64  ;;  %v67_v21 = vpop.permute.xlu1 %66 }
  0x7d   :  { %v72_v23 = vsel %vm70_vm3, %v65_v20, %v67_v21 }
  0x7e   :  { %78 = vst [vmem:[#allocation2 + $0x20] sm:$0xf0] %v72_v23  ;;  %482 = vrot.lane.b32.xlu0 %v864_v9, %s793_s25  ;;  %488 = vrot.lane.b32.xlu1 %v379_v13, %s793_s25 }
  0x80   :  { %v26_v25 = vpop.permute.xlu0 %25  ;;  %v45_v26 = vpop.permute.xlu1 %44 }
  0x81   :  { %v34_v27 = vsel %vm33_vm1, %v26_v25, %v28_v15  ;;  %v53_v28 = vsel %vm52_vm2, %v45_v26, %v47_v17  ;;  %v172_v29 = vld [vmem:[#allocation2 + $0x8] sm:$0xff] }
  0x82   :  { %40 = vst [vmem:[#allocation2] sm:$0xf0] %v34_v27  ;;  %59 = vst [vmem:[#allocation2 + $0x18] sm:$0xf] %v53_v28  ;;  %189 = vperm.xlu0 %775, %v186_v24   ;;  %518 = vperm.xlu1 %776, %v186_v24  }
  0x83   :  { %358 = vst [vmem:[#allocation2 + $0x8] sm:$0xf] %v871_v10 }
  0x84   :  { %v63_v30 = vpop.permute.xlu0 %62  ;;  %v32_v31 = vpop.permute.xlu1 %31 }
  0x85   :  { %v71_v32 = vsel %vm70_vm3, %v63_v30, %v65_v20  ;;  %v36_v33 = vsel %vm33_vm1, %v30_v16, %v32_v31  ;;  %v175_v34 = vld [vmem:[#allocation2 + $0x20] sm:$0xff] }
  0x86   :  { %77 = vst [vmem:[#allocation2 + $0x18] sm:$0xf0] %v71_v32  ;;  %42 = vst [vmem:[#allocation2 + $0x10] sm:$0xf0] %v36_v33  ;;  %v735_v35 = vpack.c.bf16 %v175_v34, %v172_v29 }
  0x88   :  { %v51_v36 = vpop.permute.xlu0 %50  ;;  %v69_v37 = vpop.permute.xlu1 %68  ;;  %736 = vmatprep.subr.bf16.mxu0 %v735_v35 }
  0x89   :  { %v55_v38 = vsel %vm52_vm2, %v49_v14, %v51_v36  ;;  %v73_v39 = vsel %vm70_vm3, %v67_v21, %v69_v37  ;;  %v171_v40 = vld [vmem:[#allocation2] sm:$0xff] }
  0x8a   :  { %61 = vst [vmem:[#allocation2 + $0x28] sm:$0xf] %v55_v38  ;;  %79 = vst [vmem:[#allocation2 + $0x28] sm:$0xf0] %v73_v39 }
  0x8b   :  { %357 = vst [vmem:[#allocation2] sm:$0xf] %v864_v9 }
  0x8c   :  { %v83_v41 = vpop.permute.xlu0 %82  ;;  %v85_v42 = vpop.permute.xlu1 %84 }
  0x8d   :  { %v90_v43 = vsel %vm88_vm4, %v83_v41, %v85_v42  ;;  %v174_v44 = vld [vmem:[#allocation2 + $0x18] sm:$0xff]  ;;  %v173_v45 = vld [vmem:[#allocation2 + $0x10] sm:$0xff] }
  0x8e   :  { %96 = vst [vmem:[#allocation2 + $0x38] sm:$0xf] %v90_v43  ;;  %v737_v46 = vpack.c.bf16 %v174_v44, %v171_v40  ;;  %359 = vst [vmem:[#allocation2 + $0x10] sm:$0xf] %v855_v7 }
  0x90   :  { %v101_v47 = vpop.permute.xlu0 %100  ;;  %v103_v48 = vpop.permute.xlu1 %102  ;;  %738 = vmatpush1.bf16.msra.mxu0 %v737_v46  ;;  %v972_v46 = vld [vmem:[%s1032_s1] sm:$0xff] }
  0x91   :  { %v108_v49 = vsel %vm106_vm5, %v101_v47, %v103_v48  ;;  %v176_v50 = vld [vmem:[#allocation2 + $0x28] sm:$0xff] }
  0x92   :  { %114 = vst [vmem:[#allocation2 + $0x38] sm:$0xf0] %v108_v49  ;;  %v744_v51 = vpack.c.bf16 %v176_v50, %v173_v45 }
  0x94   :  { %v119_v52 = vpop.permute.xlu0 %118  ;;  %745 = vmatpush3.bf16.msra.mxu1 %v744_v51  ;;  %v121_v53 = vpop.permute.xlu1 %120 }
  0x95   :  { %v126_v54 = vsel %vm124_vm6, %v119_v52, %v121_v53  ;;  %746 = vmatprep.subr.bf16.mxu1 %v788_v6 }
  0x96   :  { %132 = vst [vmem:[#allocation2 + $0x50] sm:$0xf] %v126_v54 }
  0x98   :  { %v137_v55 = vpop.permute.xlu0 %136  ;;  %v139_v56 = vpop.permute.xlu1 %138 }
  0x99   :  { %v144_v57 = vsel %vm142_vm7, %v137_v55, %v139_v56  ;;  %v178_v2 = vld [vmem:[#allocation2 + $0x38] sm:$0xff] }
  0x9a   :  { %150 = vst [vmem:[#allocation2 + $0x50] sm:$0xf0] %v144_v57 }
  0x9c   :  { %v81_v58 = vpop.permute.xlu0 %80  ;;  %v99_v59 = vpop.permute.xlu1 %98 }
  0x9d   :  { %v89_v60 = vsel %vm88_vm4, %v81_v58, %v83_v41  ;;  %v107_v61 = vsel %vm106_vm5, %v99_v59, %v101_v47 }
  0x9e   :  { %95 = vst [vmem:[#allocation2 + $0x30] sm:$0xf] %v89_v60  ;;  %113 = vst [vmem:[#allocation2 + $0x30] sm:$0xf0] %v107_v61 }
  0xa0   :  { %v117_v62 = vpop.permute.xlu0 %116  ;;  %v135_v63 = vpop.permute.xlu1 %134 }
  0xa1   :  { %v125_v0 = vsel %vm124_vm6, %v117_v62, %v119_v52  ;;  %v143_v1 = vsel %vm142_vm7, %v135_v63, %v137_v55  ;;  %v181_v3 = vld [vmem:[#allocation2 + $0x50] sm:$0xff] }
  0xa2   :  { %131 = vst [vmem:[#allocation2 + $0x48] sm:$0xf] %v125_v0  ;;  %149 = vst [vmem:[#allocation2 + $0x48] sm:$0xf0] %v143_v1  ;;  %v739_v4 = vpack.c.bf16 %v181_v3, %v178_v2 }
  0xa4   :  { %v87_v5 = vpop.permute.xlu0 %86  ;;  %v105_v7 = vpop.permute.xlu1 %104  ;;  %740 = vmatprep.subr.bf16.mxu0 %v739_v4 }
  0xa5   :  { %v91_v8 = vsel %vm88_vm4, %v85_v42, %v87_v5  ;;  %v109_v9 = vsel %vm106_vm5, %v103_v48, %v105_v7  ;;  %v177_v15 = vld [vmem:[#allocation2 + $0x30] sm:$0xff] }
  0xa6   :  { %97 = vst [vmem:[#allocation2 + $0x40] sm:$0xf] %v91_v8  ;;  %115 = vst [vmem:[#allocation2 + $0x40] sm:$0xf0] %v109_v9 }
  0xa8   :  { %v123_v10 = vpop.permute.xlu0 %122  ;;  %v141_v11 = vpop.permute.xlu1 %140 }
  0xa9   :  { %v127_v13 = vsel %vm124_vm6, %v121_v53, %v123_v10  ;;  %v145_v14 = vsel %vm142_vm7, %v139_v56, %v141_v11  ;;  %v180_v16 = vld [vmem:[#allocation2 + $0x48] sm:$0xff] }
  0xaa   :  { %133 = vst [vmem:[#allocation2 + $0x58] sm:$0xf] %v127_v13  ;;  %151 = vst [vmem:[#allocation2 + $0x58] sm:$0xf0] %v145_v14  ;;  %v741_v17 = vpack.c.bf16 %v180_v16, %v177_v15 }
  0xac   :  { %v155_v18 = vpop.permute.xlu0 %154  ;;  %v157_v19 = vpop.permute.xlu1 %156  ;;  %742 = vmatpush1.bf16.msra.mxu0 %v741_v17 }
  0xad   :  { %v162_v20 = vsel %vm160_vm8, %v155_v18, %v157_v19  ;;  %v179_v24 = vld [vmem:[#allocation2 + $0x40] sm:$0xff] }
  0xae   :  { %168 = vst [vmem:[#allocation2 + $0x68] sm:$0xf] %v162_v20 }
  0xb0   :  { %v365_v21 = vpop.permute.xlu0 %364  ;;  %v367_v22 = vpop.permute.xlu1 %366 }
  0xb1   :  { %v371_v23 = vsel %vm33_vm1, %v365_v21, %v367_v22  ;;  %v182_v25 = vld [vmem:[#allocation2 + $0x58] sm:$0xff] }
  0xb2   :  { %377 = vst [vmem:[#allocation2 + $0x8] sm:$0xf0] %v371_v23  ;;  %v747_v26 = vpack.c.bf16 %v182_v25, %v179_v24 }
  0xb4   :  { %v383_v27 = vpop.permute.xlu0 %382  ;;  %748 = vmatpush3.bf16.msra.mxu1 %v747_v26  ;;  %v385_v28 = vpop.permute.xlu1 %384 }
  0xb5   :  { %v389_v29 = vsel %vm52_vm2, %v383_v27, %v385_v28  ;;  %v184_v30 = vld [vmem:[#allocation2 + $0x68] sm:$0xf]  ;;  %717 = vmatprep.subr.mxu1 %v794_v12 }
  0xb6   :  { %395 = vst [vmem:[#allocation2 + $0x20] sm:$0xf] %v389_v29  ;;  %682 = vmatprep.subr.msk.mxu0 %vm196_vm9, %v184_v30 }
  0xb8   :  { %v400_v31 = vpop.permute.xlu0 %399  ;;  %v402_v32 = vpop.permute.xlu1 %401 }
  0xb9   :  { %v406_v33 = vsel %vm70_vm3, %v400_v31, %v402_v32  ;;  %v501_v45 = vld [vmem:[#allocation2 + $0x8] sm:$0xff] }
  0xba   :  { %412 = vst [vmem:[#allocation2 + $0x20] sm:$0xf0] %v406_v33 }
  0xbc   :  { %v153_v34 = vpop.permute.xlu0 %152  ;;  %v363_v35 = vpop.permute.xlu1 %362 }
  0xbd   :  { %v161_v36 = vsel %vm160_vm8, %v153_v34, %v155_v18  ;;  %v370_v37 = vsel %vm33_vm1, %v363_v35, %v365_v21 }
  0xbe   :  { %167 = vst [vmem:[#allocation2 + $0x60] sm:$0xf] %v161_v36  ;;  %376 = vst [vmem:[#allocation2] sm:$0xf0] %v370_v37 }
  0xc0   :  { %v381_v38 = vpop.permute.xlu0 %380  ;;  %v398_v39 = vpop.permute.xlu1 %397 }
  0xc1   :  { %v388_v40 = vsel %vm52_vm2, %v381_v38, %v383_v27  ;;  %v405_v41 = vsel %vm70_vm3, %v398_v39, %v400_v31  ;;  %v504_v42 = vld [vmem:[#allocation2 + $0x20] sm:$0xff] }
  0xc2   :  { %394 = vst [vmem:[#allocation2 + $0x18] sm:$0xf] %v388_v40  ;;  %411 = vst [vmem:[#allocation2 + $0x18] sm:$0xf0] %v405_v41  ;;  %v749_v50 = vpack.c.bf16 %v504_v42, %v501_v45 }
  0xc4   :  { %v159_v43 = vpop.permute.xlu0 %158  ;;  %v369_v44 = vpop.permute.xlu1 %368 }
  0xc5   :  { %v163_v47 = vsel %vm160_vm8, %v157_v19, %v159_v43  ;;  %v372_v48 = vsel %vm33_vm1, %v367_v22, %v369_v44  ;;  %v183_v49 = vld [vmem:[#allocation2 + $0x60] sm:$0xf] }
  0xc6   :  { %169 = vst [vmem:[#allocation2 + $0x70] sm:$0xf] %v163_v47  ;;  %378 = vst [vmem:[#allocation2 + $0x10] sm:$0xf0] %v372_v48  ;;  %683 = vmatpush1.msk.msra.mxu0 %vm196_vm9, %v183_v49  ;;  %v500_v55 = vld [vmem:[#allocation2] sm:$0xff] }
  0xc7   :  { %750 = vmatprep.subr.bf16.mxu0 %v749_v50  ;;  %684 = vmatmul.mubr.msk.f32.vlgmr.msra.gmra.mrb[0].mxu0 %vm192_vm10, %v972_v46 }
  0xc8   :  { %v387_v51 = vpop.permute.xlu0 %386  ;;  %v404_v52 = vpop.permute.xlu1 %403  ;;  %597 = vmatprep.mubr.f32.mxu0 %v794_v12 }
  0xc9   :  { %v390_v53 = vsel %vm52_vm2, %v385_v28, %v387_v51  ;;  %v407_v54 = vsel %vm70_vm3, %v402_v32, %v404_v52  ;;  %v503_v56 = vld [vmem:[#allocation2 + $0x18] sm:$0xff] }
  0xca   :  { %396 = vst [vmem:[#allocation2 + $0x28] sm:$0xf] %v390_v53  ;;  %413 = vst [vmem:[#allocation2 + $0x28] sm:$0xf0] %v407_v54  ;;  %v751_v57 = vpack.c.bf16 %v503_v56, %v500_v55 }
  0xcc   :  { %v417_v58 = vpop.permute.xlu0 %416  ;;  %v419_v59 = vpop.permute.xlu1 %418  ;;  %752 = vmatpush1.bf16.msra.mxu0 %v751_v57 }
  0xcd   :  { %v423_v60 = vsel %vm88_vm4, %v417_v58, %v419_v59  ;;  %v185_v61 = vld [vmem:[#allocation2 + $0x70] sm:$0xf] }
  0xce   :  { %429 = vst [vmem:[#allocation2 + $0x38] sm:$0xf] %v423_v60  ;;  %718 = vmatpush3.msk.msra.mxu1 %vm196_vm9, %v185_v61  ;;  %v502_v1 = vld [vmem:[#allocation2 + $0x10] sm:$0xff] }
  0xcf   :  { %757 = vmatprep.subr.bf16.mxu1 %v788_v6  ;;  %720 = vmatmul.mubr.msk.f32.vlgmr.msra.gmra.mrb[0].mxu1 %vm192_vm10, %v972_v46 }
  0xd0   :  { %v434_v62 = vpop.permute.xlu0 %433  ;;  %v436_v63 = vpop.permute.xlu1 %435  ;;  %732 = vmatprep.mubr.msk.f32.mxu1 %vm795_vm0, %v794_v12 }
  0xd1   :  { %v440_v0 = vsel %vm106_vm5, %v434_v62, %v436_v63  ;;  %v505_v2 = vld [vmem:[#allocation2 + $0x28] sm:$0xff] }
  0xd2   :  { %446 = vst [vmem:[#allocation2 + $0x38] sm:$0xf0] %v440_v0  ;;  %v758_v3 = vpack.c.bf16 %v505_v2, %v502_v1 }
  0xd4   :  { %v451_v4 = vpop.permute.xlu0 %450  ;;  %759 = vmatpush3.bf16.msra.mxu1 %v758_v3  ;;  %v453_v5 = vpop.permute.xlu1 %452 }
  0xd5   :  { %v457_v7 = vsel %vm124_vm6, %v451_v4, %v453_v5  ;;  %760 = vmatprep.subr.bf16.mxu1 %v788_v6 }
  0xd6   :  { %463 = vst [vmem:[#allocation2 + $0x50] sm:$0xf] %v457_v7 }
  0xd8   :  { %v468_v8 = vpop.permute.xlu0 %467  ;;  %v470_v9 = vpop.permute.xlu1 %469 }
  0xd9   :  { %v474_v10 = vsel %vm142_vm7, %v468_v8, %v470_v9  ;;  %v507_v19 = vld [vmem:[#allocation2 + $0x38] sm:$0xff] }
  0xda   :  { %480 = vst [vmem:[#allocation2 + $0x50] sm:$0xf0] %v474_v10 }
  0xdc   :  { %v415_v11 = vpop.permute.xlu0 %414  ;;  %v432_v13 = vpop.permute.xlu1 %431 }
  0xdd   :  { %v422_v14 = vsel %vm88_vm4, %v415_v11, %v417_v58  ;;  %v439_v15 = vsel %vm106_vm5, %v432_v13, %v434_v62 }
  0xde   :  { %428 = vst [vmem:[#allocation2 + $0x30] sm:$0xf] %v422_v14  ;;  %445 = vst [vmem:[#allocation2 + $0x30] sm:$0xf0] %v439_v15 }
  0xe0   :  { %v449_v16 = vpop.permute.xlu0 %448  ;;  %v466_v17 = vpop.permute.xlu1 %465 }
  0xe1   :  { %v456_v18 = vsel %vm124_vm6, %v449_v16, %v451_v4  ;;  %v473_v6 = vsel %vm142_vm7, %v466_v17, %v468_v8  ;;  %v510_v20 = vld [vmem:[#allocation2 + $0x50] sm:$0xff] }
  0xe2   :  { %462 = vst [vmem:[#allocation2 + $0x48] sm:$0xf] %v456_v18  ;;  %479 = vst [vmem:[#allocation2 + $0x48] sm:$0xf0] %v473_v6  ;;  %v753_v21 = vpack.c.bf16 %v510_v20, %v507_v19 }
  0xe4   :  { %v421_v22 = vpop.permute.xlu0 %420  ;;  %v438_v23 = vpop.permute.xlu1 %437  ;;  %754 = vmatprep.subr.bf16.mxu0 %v753_v21 }
  0xe5   :  { %v424_v24 = vsel %vm88_vm4, %v419_v59, %v421_v22  ;;  %v441_v25 = vsel %vm106_vm5, %v436_v63, %v438_v23  ;;  %v506_v30 = vld [vmem:[#allocation2 + $0x30] sm:$0xff] }
  0xe6   :  { %430 = vst [vmem:[#allocation2 + $0x40] sm:$0xf] %v424_v24  ;;  %447 = vst [vmem:[#allocation2 + $0x40] sm:$0xf0] %v441_v25 }
  0xe8   :  { %v455_v26 = vpop.permute.xlu0 %454  ;;  %v472_v27 = vpop.permute.xlu1 %471 }
  0xe9   :  { %v458_v28 = vsel %vm124_vm6, %v453_v5, %v455_v26  ;;  %v475_v29 = vsel %vm142_vm7, %v470_v9, %v472_v27  ;;  %v509_v31 = vld [vmem:[#allocation2 + $0x48] sm:$0xff] }
  0xea   :  { %464 = vst [vmem:[#allocation2 + $0x58] sm:$0xf] %v458_v28  ;;  %481 = vst [vmem:[#allocation2 + $0x58] sm:$0xf0] %v475_v29  ;;  %v755_v32 = vpack.c.bf16 %v509_v31, %v506_v30 }
  0xec   :  { %v485_v33 = vpop.permute.xlu0 %484  ;;  %v487_v34 = vpop.permute.xlu1 %486  ;;  %756 = vmatpush1.bf16.msra.mxu0 %v755_v32 }
  0xed   :  { %v491_v35 = vsel %vm160_vm8, %v485_v33, %v487_v34  ;;  %v508_v40 = vld [vmem:[#allocation2 + $0x40] sm:$0xff] }
  0xee   :  { %497 = vst [vmem:[#allocation2 + $0x68] sm:$0xf] %v491_v35 }
  0xf0   :  { %v483_v36 = vpop.permute.xlu0 %482  ;;  %v489_v37 = vpop.permute.xlu1 %488 }
  0xf1   :  { %v490_v38 = vsel %vm160_vm8, %v483_v36, %v485_v33  ;;  %v492_v39 = vsel %vm160_vm8, %v487_v34, %v489_v37  ;;  %v511_v41 = vld [vmem:[#allocation2 + $0x58] sm:$0xff] }
  0xf2   :  { %496 = vst [vmem:[#allocation2 + $0x60] sm:$0xf] %v490_v38  ;;  %498 = vst [vmem:[#allocation2 + $0x70] sm:$0xf] %v492_v39  ;;  %v761_v42 = vpack.c.bf16 %v511_v41, %v508_v40 }
  0xf4   :  { %762 = vmatpush3.bf16.msra.mxu1 %v761_v42 }
  0xf5   :  { %v513_v43 = vld [vmem:[#allocation2 + $0x68] sm:$0xf]  ;;  %730 = vmatprep.subr.mxu1 %v794_v12 }
  0xf6   :  { %689 = vmatprep.subr.msk.mxu0 %vm196_vm9, %v513_v43 }
  0xf9   :  { %v512_v44 = vld [vmem:[#allocation2 + $0x60] sm:$0xf]  ;;  %v514_v45 = vld [vmem:[#allocation2 + $0x70] sm:$0xf] }
  0xfa   :  { %690 = vmatpush1.msk.msra.mxu0 %vm196_vm9, %v512_v44  ;;  %731 = vmatpush3.msk.msra.mxu1 %vm196_vm9, %v514_v45 }
  0xfb   :  { %691 = vmatmul.mubr.msk.f32.vlgmr.msra.gmra.mrb[2].mxu0 %vm192_vm10, %v972_v46  ;;  %733 = vmatmul.mubr.msk.f32.vlgmr.msra.gmra.mrb[2].mxu1 %vm192_vm10, %v972_v46 }
 0x101   :  { %v190_v47 = vpop.permute.xlu0 %189  ;;  %v519_v46 = vpop.permute.xlu1 %518 }
 0x19a   :  { %v272_v48 = vpop.f32.mrb[0].mxu0 }
 0x19b   :  { %v273_v49 = vadd.f32 %v272_v48, %v190_v47  ;;  %v274_v50 = vpop.f32.mrb[1].mxu0 }
 0x19c   :  { %v275_v51 = vadd.f32 %v274_v50, %v190_v47 }
 0x19d   :  { %347 = vst [vmem:[%s1033_s3] sm:$0xff] %v273_v49 }
 0x19e   :  { %348 = vst [vmem:[%s1033_s3 + $0x8] sm:$0xff] %v275_v51 }
 0x1a2   :  { %v343_v12 = vpop.f32.mrb[0].mxu1 }
 0x1a3   :  { %v344_v52 = vadd.f32 %v343_v12, %v190_v47  ;;  %v721_v53 = vpop.f32.mrb[1].mxu1 }
 0x1a5   :  { %349 = vst [vmem:[%s1033_s3 + $0x10] sm:$0xff] %v344_v52 }
 0x1ce   :  { %v670_v54 = vpop.f32.mrb[2].mxu1  ;;  %v599_v55 = vpop.f32.mrb[2].mxu0 }
 0x1cf   :  { %v671_v56 = vadd.f32 %v670_v54, %v519_v46  ;;  %v600_v57 = vadd.f32 %v599_v55, %v519_v46  ;;  %v601_v58 = vpop.f32.mrb[3].mxu0  ;;  %v734_v59 = vpop.f32.mrb[3].mxu1 }
 0x1d0   :  { %v602_v60 = vadd.f32 %v601_v58, %v519_v46 }
 0x1d1   :  { %696 = vst [vmem:[%s1033_s3 + $0x28] sm:$0xff] %v671_v56  ;;  %694 = vst [vmem:[%s1033_s3 + $0x18] sm:$0xff] %v600_v57 }
 0x1d2   :  { %695 = vst [vmem:[%s1033_s3 + $0x20] sm:$0xff] %v602_v60 }

</bundles_post_ra>
